<compile_context>
chip_gen: v7x
topology: tpu7x:2x2x1
jax: 0.10.0
libtpu: 0.0.40
codegen_flags: <defaults>
</compile_context>

<pallas_src>
import jax
import jax.numpy as jnp
from jax.experimental import pallas as pl
from jax.experimental.pallas import tpu as pltpu

TOPK = 16  # default k of get_unq_idx_topk


def _use_int8_mxu() -> bool:
    """int8 x int8 -> int32 on the MXU where supported; bf16 widen on v7x."""
    try:
        kind = jax.devices()[0].device_kind.lower()
    except Exception:
        return True
    return not ("v7" in kind or "7x" in kind)


def _round_up(v: int, m: int) -> int:
    return ((v + m - 1) // m) * m


def _pad2(a, rows, cols):
    r, c = a.shape
    if r == rows and c == cols:
        return a
    return jnp.pad(a, ((0, rows - r), (0, cols - c)))


# ---------------------------------------------------------------------------
# quantize_mat: fp16 per-row scale = absmax/127, int8 = trunc(mat / scale)
# (PyTorch .to(torch.int8) truncates toward zero, as does XLA's f32->int cast.)
# NOTE: like the PyTorch module, no zero-row guard here (weights).
# ---------------------------------------------------------------------------
def quantize_mat(mat):
    max_val = (jnp.max(jnp.abs(mat), axis=-1) / 127.0).astype(jnp.float16)
    q = (mat / max_val[..., None]).astype(jnp.int8)
    return q, max_val


def quantize_activations(mat):
    """Per-token dynamic quantization with a zero-row guard.

    Same math as quantize_mat, but a row that is entirely zero (e.g. its only
    nonzeros were outlier columns that got masked out) yields scale 0 and
    int8 zeros instead of the inf/NaN the unguarded PyTorch code would give.
    """
    scale = (jnp.max(jnp.abs(mat), axis=-1, keepdims=True) / 127.0).astype(
        jnp.float16).astype(jnp.float32)          # exact fp16 values, f32 box
    safe = jnp.where(scale == 0.0, 1.0, scale)
    q = (mat / safe).astype(jnp.int8)
    return q, scale


# ---------------------------------------------------------------------------
# Pallas kernel factory: tiled int8 GEMM with fused dequant epilogue.
#   inner loop : acc += x_q_tile @ W_q_tile        (int8 MXU / bf16 on v7x)
#   epilogue   : out = acc * (x_max (x) w_max) + x_unq @ W_unq [+ bias]
# ---------------------------------------------------------------------------
def _make_w8dx_kernel(use_int8_mxu: bool, has_bias: bool):
    def kernel(xq_ref, wq_ref, xmax_ref, wmax_ref, xunq_ref, wunq_ref, *rest):
        if has_bias:
            bias_ref, out_ref, acc_ref = rest
        else:
            bias_ref = None
            out_ref, acc_ref = rest

        k = pl.program_id(2)

        @pl.when(k == 0)
        def _():
            acc_ref[...] = jnp.zeros_like(acc_ref)

        if use_int8_mxu:
            # Native int8 MXU path: exact int32 accumulation (MatMulInteger).
            acc_ref[...] += jnp.dot(xq_ref[...], wq_ref[...],
                                    preferred_element_type=jnp.int32)
        else:
            # v7x has no integer MXU: widen int8 -> bf16 (exact), f32 acc.
            acc_ref[...] += jnp.dot(xq_ref[...].astype(jnp.bfloat16),
                                    wq_ref[...].astype(jnp.bfloat16),
                                    preferred_element_type=jnp.float32)

        @pl.when(k == pl.num_programs(2) - 1)
        def _():
            # per-token activation scale (tm,1) x per-output weight scale (1,tn)
            res = acc_ref[...].astype(jnp.float32) * (
                xmax_ref[...] * wmax_ref[...])
            # high-precision outlier path (rank-TOPK, bf16 ops, f32 accumulate,
            # zero-padded to a full 128-lane contraction)
            res = res + jnp.dot(xunq_ref[...], wunq_ref[...],
                                preferred_element_type=jnp.float32)
            if has_bias:
                res = res + bias_ref[...]
            out_ref[...] = res.astype(out_ref.dtype)

    return kernel


def w8dx_matmul(x_q, x_max, w_q, w_max, x_unq, w_unq, bias, out_dtype,
                use_int8_mxu=None):
    M, K = x_q.shape
    Kw, N = w_q.shape
    kk = x_unq.shape[-1]
    assert Kw == K and w_unq.shape == (kk, N)
    if use_int8_mxu is None:
        use_int8_mxu = _use_int8_mxu()
    has_bias = bias is not None

    # ---- tile selection: 512-class tiles, never fall back to the full dim ----
    tm = min(512, _round_up(max(M, 1), 32))    # 32: int8 sublane packing
    tk = min(512, _round_up(K, 128))
    tn = min(512, _round_up(N, 128))
    Mp, Kp, Np = _round_up(M, tm), _round_up(K, tk), _round_up(N, tn)
    # v7x has 2 TensorCores: when M fits in one row tile, keep >=2 output
    # column tiles so the "parallel" j axis gives both cores work.
    if Mp // tm == 1 and Np // tn == 1 and N > 128:
        tn = _round_up((N + 1) // 2, 128)
        Np = _round_up(N, tn)

    # Pad the rank-kk outlier contraction to a full 128-lane width.
    ku = _round_up(kk, 128)

    # ---- zero-pad operands to the padded grid (padded rows/cols sliced off) --
    x_q = _pad2(x_q, Mp, Kp)
    w_q = _pad2(w_q, Kp, Np)
    x_max = _pad2(x_max.astype(jnp.float32), Mp, 1)
    w_max = _pad2(w_max.astype(jnp.float32), 1, Np)
    x_unq = _pad2(x_unq.astype(jnp.bfloat16), Mp, ku)
    w_unq = _pad2(w_unq.astype(jnp.bfloat16), ku, Np)
    if has_bias:
        bias = _pad2(bias.astype(jnp.float32), 1, Np)

    grid = (Mp // tm, Np // tn, Kp // tk)
    grid_m, grid_n, grid_k = grid
    acc_dtype = jnp.int32 if use_int8_mxu else jnp.float32
    out_bytes = jnp.dtype(out_dtype).itemsize

    in_specs = [
        pl.BlockSpec((tm, tk), lambda i, j, k: (i, k)),   # x_q    int8
        pl.BlockSpec((tk, tn), lambda i, j, k: (k, j)),   # W_q    int8
        pl.BlockSpec((tm, 1), lambda i, j, k: (i, 0)),    # x_max  f32 (fp16 vals)
        pl.BlockSpec((1, tn), lambda i, j, k: (0, j)),    # w_max  f32 (fp16 vals)
        pl.BlockSpec((tm, ku), lambda i, j, k: (i, 0)),   # x_unq  bf16 (padded)
        pl.BlockSpec((ku, tn), lambda i, j, k: (0, j)),   # W_unq  bf16 (padded)
    ]
    args = [x_q, w_q, x_max, w_max, x_unq, w_unq]
    if has_bias:
        in_specs.append(pl.BlockSpec((1, tn), lambda i, j, k: (0, j)))
        args.append(bias)

    # ---- explicit VMEM budget from the tile working set (double-buffered) ----
    vmem_est = (2 * (tm * tk + tk * tn)                  # int8 operand streams
                + 2 * (tm * 4 + tn * 4)                  # scales
                + 2 * 2 * (tm * ku + ku * tn)            # bf16 outlier operands
                + (2 * tn * 4 if has_bias else 0)        # bias
                + 2 * tm * tn * out_bytes                # output tiles
                + tm * tn * 4)                           # accumulator scratch
    vmem_limit = int(min(64 << 20, max(32 << 20, 2 * vmem_est + (8 << 20))))

    # ---- cost estimate reflecting the actual HBM re-streaming ----------------
    cost = pl.CostEstimate(
        flops=2 * Mp * Np * Kp + 2 * Mp * Np * ku + 3 * Mp * Np,
        transcendentals=0,
        bytes_accessed=(
            Mp * Kp * grid_n + Kp * Np * grid_m            # int8 streams
            + 4 * Mp * grid_n + 4 * Np * grid_m            # scales
            + 2 * (Mp * ku * grid_n + ku * Np * grid_m)    # bf16 outliers
            + (4 * Np * grid_m if has_bias else 0)
            + out_bytes * Mp * Np),
    )

    out = pl.pallas_call(
        _make_w8dx_kernel(use_int8_mxu, has_bias),
        out_shape=jax.ShapeDtypeStruct((Mp, Np), out_dtype),
        grid=grid,
        in_specs=in_specs,
        out_specs=pl.BlockSpec((tm, tn), lambda i, j, k: (i, j)),
        scratch_shapes=[pltpu.VMEM((tm, tn), acc_dtype)],
        compiler_params=pltpu.CompilerParams(
            dimension_semantics=("parallel", "parallel", "arbitrary"),
            vmem_limit_bytes=vmem_limit),
        cost_estimate=cost,
    )(*args)

    if Mp != M or Np != N:
        out = out[:M, :N]
    return out


# ---------------------------------------------------------------------------
# Jitted forward: fused XLA prologue (top-k, mask, dynamic quant, gathers)
# followed by the Pallas GEMM.  Jitting keeps the prologue to ~2 passes over
# the (M,K) activation instead of several materialized f32 copies.
# ---------------------------------------------------------------------------
def _w8dx_forward_impl(x, weight_q, max_val, bias):
    K = x.shape[-1]
    lead = x.shape[:-1]
    x2 = x.reshape(-1, K)

    # get_unq_idx_topk: top-k columns by per-column max |x| (native dtype).
    # TODO(synk): data-dependent top-k + column gather has no clean Pallas
    # equivalent on TPU; kept as tiny XLA glue fused under jit.
    col_absmax = jnp.max(jnp.abs(x2), axis=0).astype(jnp.float32)
    _, idx_unq = jax.lax.top_k(col_absmax, TOPK)
    t = jnp.ones((K,), jnp.float32).at[idx_unq].set(0.0)

    # decomposition: quantized part (outlier cols zeroed) + fp outlier cols.
    # TODO(synk): the reference `decomposition` literally returns
    # (mat[unq_idx], mat*t), indexing token rows with column indices
    # (shape-inconsistent for general inputs); we implement the intended
    # LLM.int8-style split the rest of forward() assumes.
    x_masked = x2.astype(jnp.float32) * t
    # dynamic per-token activation quantization (fp16-rounded scales, int8).
    # TODO(synk): the fp16 scale-rounding step stays in XLA (not a Pallas
    # prologue) because fp16 casts are not reliably lowerable inside Mosaic.
    x_q, x_max = quantize_activations(x_masked)          # (M,K) i8, (M,1) f32
    x_unq = jnp.take(x2, idx_unq, axis=-1).astype(jnp.bfloat16)   # (M, TOPK)

    # Outlier weight rows dequantized exactly as the PyTorch module writes it:
    # weight_q[idx,:] * max_val / 127 (keeping its literal extra /127.0).
    w_unq = ((jnp.take(weight_q, idx_unq, axis=0).astype(jnp.float32)
              * max_val.astype(jnp.float32)[None, :]) / 127.0
             ).astype(jnp.bfloat16)

    w_max = max_val.astype(jnp.float32)[None, :]
    b = None if bias is None else bias.astype(jnp.float32)[None, :]

    out = w8dx_matmul(x_q, x_max, weight_q, w_max, x_unq, w_unq, b, x.dtype)
    return out.reshape(*lead, -1)


_w8dx_forward = jax.jit(_w8dx_forward_impl)


# ---------------------------------------------------------------------------
# Module port
# ---------------------------------------------------------------------------
class W8DXLinear:
    def __init__(self, origin_weight, bias=None):
        self.dtype = origin_weight.dtype
        w_q, max_val = quantize_mat(origin_weight)   # (N,K) int8, (N,) fp16
        self.weight_q = w_q.T                        # (K, N) int8
        self.max_val = max_val                       # (N,)   fp16
        self.bias = bias

    def __call__(self, x):
        return _w8dx_forward(x, self.weight_q, self.max_val, self.bias)


# pure-JAX reference of the same math (sanity check only)
def reference_forward(layer, x):
    K = x.shape[-1]
    lead = x.shape[:-1]
    x2 = x.reshape(-1, K).astype(jnp.float32)
    col_absmax = jnp.max(jnp.abs(x2), axis=0)
    _, idx = jax.lax.top_k(col_absmax, TOPK)
    t = jnp.ones((K,), jnp.float32).at[idx].set(0.0)
    x_q, x_max = quantize_activations(x2 * t)
    res_q = (x_q.astype(jnp.float32) @ layer.weight_q.astype(jnp.float32)) * (
        x_max * layer.max_val.astype(jnp.float32)[None, :])
    w_unq = (jnp.take(layer.weight_q, idx, axis=0).astype(jnp.float32)
             * layer.max_val.astype(jnp.float32)[None, :]) / 127.0
    res_unq = jnp.take(x2, idx, axis=-1) @ w_unq
    if layer.bias is not None:
        res_unq = res_unq + layer.bias.astype(jnp.float32)[None, :]
    return (res_q + res_unq).astype(x.dtype).reshape(*lead, -1)


if __name__ == "__main__":
    key = jax.random.PRNGKey(0)
    k_w, k_b, k_x, k_w2, k_x2 = jax.random.split(key, 5)

    # Case 1: tile-friendly shapes, with bias.
    B, S = 2, 8                     # batch, seq  -> M = 16 tokens
    K, N = 512, 512                 # in_features, out_features
    origin_weight = jax.random.normal(k_w, (N, K), dtype=jnp.float32)
    bias = jax.random.normal(k_b, (N,), dtype=jnp.float32) * 0.1
    x = jax.random.normal(k_x, (B, S, K), dtype=jnp.float32)

    layer = W8DXLinear(origin_weight, bias)
    out = jax.block_until_ready(layer(x))
    assert out.shape == (B, S, N) and out.dtype == x.dtype
    ref = jax.block_until_ready(reference_forward(layer, x))
    assert jnp.allclose(out, ref, rtol=1e-3, atol=1e-2), "mismatch (bias)"

    # Case 2: non-divisible shapes, no bias (exercises the padding path and
    # the bias-free kernel variant).
    K2, N2 = 320, 200
    origin_weight2 = jax.random.normal(k_w2, (N2, K2), dtype=jnp.float32)
    x2 = jax.random.normal(k_x2, (3, 5, K2), dtype=jnp.float32)
    layer2 = W8DXLinear(origin_weight2, None)
    out2 = jax.block_until_ready(layer2(x2))
    assert out2.shape == (3, 5, N2) and out2.dtype == x2.dtype
    ref2 = jax.block_until_ready(reference_forward(layer2, x2))
    assert jnp.allclose(out2, ref2, rtol=1e-3, atol=1e-2), "mismatch (padded)"

    print("KERNEL_OK")
</pallas_src>

<mosaic_0001>
module attributes {stable_mosaic.version = 11 : i64} {
  func.func @kernel(%arg0: i32, %arg1: i32, %arg2: i32, %arg3: memref<32x512xi8, #tpu.memory_space<vmem>>, %arg4: memref<512x256xi8, #tpu.memory_space<vmem>>, %arg5: memref<32x1xf32, #tpu.memory_space<vmem>>, %arg6: memref<1x256xf32, #tpu.memory_space<vmem>>, %arg7: memref<32x128xbf16, #tpu.memory_space<vmem>>, %arg8: memref<128x256xbf16, #tpu.memory_space<vmem>>, %arg9: memref<1x256xf32, #tpu.memory_space<vmem>>, %arg10: memref<32x256xf32, #tpu.memory_space<vmem>>, %arg11: memref<32x256xi32, #tpu.memory_space<vmem>>) attributes {dimension_semantics = [#tpu.dimension_semantics<parallel>, #tpu.dimension_semantics<parallel>, #tpu.dimension_semantics<arbitrary>], iteration_bounds = array<i64: 1, 2, 1>, scalar_prefetch = 0 : i64, scratch_operands = 1 : i64, tpu.core_type = #tpu.core_type<tc>, window_params = [{transform_indices = @transform_0, window_bounds = array<i64: 32, 512>}, {transform_indices = @transform_1, window_bounds = array<i64: 512, 256>}, {transform_indices = @transform_2, window_bounds = array<i64: 32, 1>}, {transform_indices = @transform_3, window_bounds = array<i64: 1, 256>}, {transform_indices = @transform_4, window_bounds = array<i64: 32, 128>}, {transform_indices = @transform_5, window_bounds = array<i64: 128, 256>}, {transform_indices = @transform_6, window_bounds = array<i64: 1, 256>}, {transform_indices = @transform_7, window_bounds = array<i64: 32, 256>}]} {
    %c0_i32 = arith.constant 0 : i32
    %0 = arith.cmpi eq, %arg2, %c0_i32 : i32
    %1 = arith.extui %0 : i1 to i32
    %c0_i32_0 = arith.constant 0 : i32
    %2 = arith.cmpi ne, %1, %c0_i32_0 : i32
    scf.if %2 {
      %c0_i32_10 = arith.constant 0 : i32
      %12 = vector.broadcast %c0_i32_10 : i32 to vector<32x256xi32>
      %c0_11 = arith.constant 0 : index
      %c0_12 = arith.constant 0 : index
      %13 = vector.load %arg11[%c0_11, %c0_12] : memref<32x256xi32, #tpu.memory_space<vmem>>, vector<32x256xi32>
      tpu.vector_store %arg11[%c0_11, %c0_12], %12 {strides = array<i32>} : memref<32x256xi32, #tpu.memory_space<vmem>>, vector<32x256xi32>,
    } else {
    }
    %c0 = arith.constant 0 : index
    %c0_1 = arith.constant 0 : index
    %3 = vector.load %arg11[%c0, %c0_1] : memref<32x256xi32, #tpu.memory_space<vmem>>, vector<32x256xi32>
    %c0_2 = arith.constant 0 : index
    %c0_3 = arith.constant 0 : index
    %4 = vector.load %arg3[%c0_2, %c0_3] : memref<32x512xi8, #tpu.memory_space<vmem>>, vector<32x512xi8>
    %c0_4 = arith.constant 0 : index
    %c0_5 = arith.constant 0 : index
    %5 = vector.load %arg4[%c0_4, %c0_5] : memref<512x256xi8, #tpu.memory_space<vmem>>, vector<512x256xi8>
    %cst = arith.constant dense<0> : vector<32x256xi32>
    %6 = tpu.matmul %4, %5, %cst {dimension_numbers = #tpu.dot_dimension_numbers<[1], [0], [0], [1], [0, 0, 1, 1], [], []>} : vector<32x512xi8>, vector<512x256xi8>, vector<32x256xi32> -> vector<32x256xi32>
    %7 = arith.addi %3, %6 : vector<32x256xi32>
    %c0_6 = arith.constant 0 : index
    %c0_7 = arith.constant 0 : index
    %8 = vector.load %arg11[%c0_6, %c0_7] : memref<32x256xi32, #tpu.memory_space<vmem>>, vector<32x256xi32>
    tpu.vector_store %arg11[%c0_6, %c0_7], %7 {strides = array<i32>} : memref<32x256xi32, #tpu.memory_space<vmem>>, vector<32x256xi32>,
    %c0_i32_8 = arith.constant 0 : i32
    %9 = arith.cmpi eq, %arg2, %c0_i32_8 : i32
    %10 = arith.extui %9 : i1 to i32
    %c0_i32_9 = arith.constant 0 : i32
    %11 = arith.cmpi ne, %10, %c0_i32_9 : i32
    scf.if %11 {
      %c0_10 = arith.constant 0 : index
      %c0_11 = arith.constant 0 : index
      %12 = vector.load %arg11[%c0_10, %c0_11] : memref<32x256xi32, #tpu.memory_space<vmem>>, vector<32x256xi32>
      %13 = arith.sitofp %12 : vector<32x256xi32> to vector<32x256xf32>
      %c0_12 = arith.constant 0 : index
      %c0_13 = arith.constant 0 : index
      %14 = vector.load %arg5[%c0_12, %c0_13] : memref<32x1xf32, #tpu.memory_space<vmem>>, vector<32x1xf32>
      %c0_14 = arith.constant 0 : index
      %c0_15 = arith.constant 0 : index
      %15 = vector.load %arg6[%c0_14, %c0_15] : memref<1x256xf32, #tpu.memory_space<vmem>>, vector<1x256xf32>
      %16 = vector.broadcast %14 : vector<32x1xf32> to vector<32x256xf32>
      %17 = vector.broadcast %15 : vector<1x256xf32> to vector<32x256xf32>
      %18 = arith.mulf %16, %17 : vector<32x256xf32>
      %19 = arith.mulf %13, %18 : vector<32x256xf32>
      %c0_16 = arith.constant 0 : index
      %c0_17 = arith.constant 0 : index
      %20 = vector.load %arg7[%c0_16, %c0_17] : memref<32x128xbf16, #tpu.memory_space<vmem>>, vector<32x128xbf16>
      %c0_18 = arith.constant 0 : index
      %c0_19 = arith.constant 0 : index
      %21 = vector.load %arg8[%c0_18, %c0_19] : memref<128x256xbf16, #tpu.memory_space<vmem>>, vector<128x256xbf16>
      %cst_20 = arith.constant dense<0.000000e+00> : vector<32x256xf32>
      %22 = tpu.matmul %20, %21, %cst_20 {dimension_numbers = #tpu.dot_dimension_numbers<[1], [0], [0], [1], [0, 0, 1, 1], [], []>} : vector<32x128xbf16>, vector<128x256xbf16>, vector<32x256xf32> -> vector<32x256xf32>
      %23 = arith.addf %19, %22 : vector<32x256xf32>
      %c0_21 = arith.constant 0 : index
      %c0_22 = arith.constant 0 : index
      %24 = vector.load %arg9[%c0_21, %c0_22] : memref<1x256xf32, #tpu.memory_space<vmem>>, vector<1x256xf32>
      %25 = vector.broadcast %24 : vector<1x256xf32> to vector<32x256xf32>
      %26 = arith.addf %23, %25 : vector<32x256xf32>
      %c0_23 = arith.constant 0 : index
      %c0_24 = arith.constant 0 : index
      %27 = vector.load %arg10[%c0_23, %c0_24] : memref<32x256xf32, #tpu.memory_space<vmem>>, vector<32x256xf32>
      tpu.vector_store %arg10[%c0_23, %c0_24], %26 {strides = array<i32>} : memref<32x256xf32, #tpu.memory_space<vmem>>, vector<32x256xf32>,
    } else {
    }
    return
  }
  func.func @transform_0(%arg0: i32, %arg1: i32, %arg2: i32) -> (i32, i32) {
    %c0_i32 = arith.constant 0 : i32
    return %arg0, %arg2 : i32, i32
  }
  func.func @transform_1(%arg0: i32, %arg1: i32, %arg2: i32) -> (i32, i32) {
    %c0_i32 = arith.constant 0 : i32
    return %arg2, %arg1 : i32, i32
  }
  func.func @transform_2(%arg0: i32, %arg1: i32, %arg2: i32) -> (i32, i32) {
    %c0_i32 = arith.constant 0 : i32
    %c0_i32_0 = arith.constant 0 : i32
    return %arg0, %c0_i32 : i32, i32
  }
  func.func @transform_3(%arg0: i32, %arg1: i32, %arg2: i32) -> (i32, i32) {
    %c0_i32 = arith.constant 0 : i32
    %c0_i32_0 = arith.constant 0 : i32
    return %c0_i32, %arg1 : i32, i32
  }
  func.func @transform_4(%arg0: i32, %arg1: i32, %arg2: i32) -> (i32, i32) {
    %c0_i32 = arith.constant 0 : i32
    %c0_i32_0 = arith.constant 0 : i32
    return %arg0, %c0_i32 : i32, i32
  }
  func.func @transform_5(%arg0: i32, %arg1: i32, %arg2: i32) -> (i32, i32) {
    %c0_i32 = arith.constant 0 : i32
    %c0_i32_0 = arith.constant 0 : i32
    return %c0_i32, %arg1 : i32, i32
  }
  func.func @transform_6(%arg0: i32, %arg1: i32, %arg2: i32) -> (i32, i32) {
    %c0_i32 = arith.constant 0 : i32
    %c0_i32_0 = arith.constant 0 : i32
    return %c0_i32, %arg1 : i32, i32
  }
  func.func @transform_7(%arg0: i32, %arg1: i32, %arg2: i32) -> (i32, i32) {
    %c0_i32 = arith.constant 0 : i32
    return %arg0, %arg1 : i32, i32
  }
}

</mosaic_0001>

<bundles_post_ra>
// kernel: _w8dx_forward_impl.1
= control target key start
LH: loop header
LB: loop body
LE: loop exit
PB: predicated region body
PF: predicated region fallthrough
CT: control target
= control target key end

     0   :  { %s1591_s24 = smov 0   ;;  %s1593_s25 = smov 0   ;;  %s1872_s0 = inlined_call_operand.vmem [shape: s8[32,512], index: 0, kind: input, shape index: {}]   ;;  %s1873_s1 = inlined_call_operand.vmem [shape: s8[512,512], index: 1, kind: input, shape index: {}]   ;;  %s1874_s2 = inlined_call_operand.vmem [shape: f32[32,1], index: 2, kind: input, shape index: {}]   ;;  %s1875_s3 = inlined_call_operand.vmem [shape: f32[1,512], index: 3, kind: input, shape index: {}]   ;;  %s1876_s4 = inlined_call_operand.vmem [shape: bf16[32,128], index: 4, kind: input, shape index: {}]   ;;  %s1877_s5 = inlined_call_operand.vmem [shape: bf16[128,512], index: 5, kind: input, shape index: {}]   ;;  %s1878_s6 = inlined_call_operand.vmem [shape: f32[1,512], index: 6, kind: input, shape index: {}]   ;;  %s1879_s7 = inlined_call_operand.vmem [shape: f32[32,512], index: 7, kind: output, shape index: {}]  }
   0x1   :  { %s1595_s26 = smov 0   ;;  %s1597_s27 = smov 0  }
   0x2   :  { %s1599_s28 = smov 0  }
   0x3 LB: > { %s32_s29 = sadd.s32 1, %s1544_s27  ;;  %s1356_s30 = sadd.s32 4294967295, %s1548_s28   ;;  %s1548_s28 = sphi %s1599_s28, %s17_s28   ;;  %s1544_s27 = sphi %s1597_s27, %s1885_s27   ;;  %s1540_s26 = sphi %s1595_s26, %s1884_s26   ;;  %s1536_s25 = sphi %s1593_s25, %s1883_s25   ;;  %s1532_s24 = sphi %s1591_s24, %s1882_s24  }
   0x4   : > { %p34_p0 = scmp.ge.s32.totalorder %s32_s29, 2  ;;  %p80_p1 = scmp.ne.s32.totalorder %s1536_s25, %s1532_s24 }
   0x5   : > { %p81_p2 = scmp.eq.s32.totalorder %s1548_s28, 0  ;;  %p242_p4 = scmp.eq.s32.totalorder %s1356_s30, 1 }
   0x6   : > { %s1887_s29 = smov (%p34_p0, %s32_s29), 0  ;;  %s73_s10 = sadd.s32 1, %s1536_s25 }
   0x7   : > { %p1623_p3 = por %p81_p2, %p80_p1  ;;  %s69_s9 = ssub.s32 %s1544_s27, %s1887_s29 }
   0x8   : > { %p71_p5 = scmp.eq.s32.totalorder %s69_s9, 0  ;;  %p1630_p6 = por %p242_p4, %p80_p1 }
   0x9   : > { %p1362_p7 = scmp.ge.s32.totalorder %s1548_s28, 2 }
   0xa   : > { %s1635_s12 = scalar_select %p71_p5, %s1536_s25, %s73_s10  }
   0xb   : > { %295 = sbr.rel (%p1362_p7) target bundleno = 50 (0x32), region = 28 }
  0x12   : > { %298 = sbr.rel (!%p1623_p3) target bundleno = 38 (0x26), region = 32  ;;  %s300_s13 = sand.u32 (%p1623_p3), 1, %s1536_s25  }
  0x13   : > { %s1398_s14 = sshll.u32 (%p1623_p3), %s1544_s27, 4  ;;  %s1363_s15 = sshll.u32 (%p1623_p3), %s300_s13, 8 }
  0x14   : > { %s1645_s18 = scalar_lea.vmem (%p1623_p3), %s1873_s1, %s1398_s14  ;;  %s1650_s19 = scalar_lea.vmem (%p1623_p3), [#allocation3], %s1363_s15 }
  0x15   : > { %v321_v0 = vld [vmem:[%s1645_s18] sm:$0xff] (%p1623_p3)  ;;  %v323_v1 = vld [vmem:[%s1645_s18 + $0x8] sm:$0xff] (%p1623_p3) }
  0x16   : > { %v325_v2 = vld [vmem:[%s1645_s18 + $0x20] sm:$0xff] (%p1623_p3)  ;;  %322 = vst [vmem:[%s1650_s19] sm:$0xff] (%p1623_p3), %v321_v0  ;;  %324 = vst [vmem:[%s1650_s19 + $0x8] sm:$0xff] (%p1623_p3), %v323_v1  ;;  %v327_v3 = vld [vmem:[%s1645_s18 + $0x28] sm:$0xff] (%p1623_p3) }
  0x17   : > { %326 = vst [vmem:[%s1650_s19 + $0x10] sm:$0xff] (%p1623_p3), %v325_v2  ;;  %v329_v4 = vld [vmem:[%s1645_s18 + $0x40] sm:$0xff] (%p1623_p3)  ;;  %v331_v5 = vld [vmem:[%s1645_s18 + $0x48] sm:$0xff] (%p1623_p3)  ;;  %328 = vst [vmem:[%s1650_s19 + $0x18] sm:$0xff] (%p1623_p3), %v327_v3 }
  0x18   : > { %330 = vst [vmem:[%s1650_s19 + $0x20] sm:$0xff] (%p1623_p3), %v329_v4  ;;  %332 = vst [vmem:[%s1650_s19 + $0x28] sm:$0xff] (%p1623_p3), %v331_v5  ;;  %v333_v6 = vld [vmem:[%s1645_s18 + $0x60] sm:$0xff] (%p1623_p3)  ;;  %v335_v7 = vld [vmem:[%s1645_s18 + $0x68] sm:$0xff] (%p1623_p3) }
  0x19   : > { %v337_v8 = vld [vmem:[%s1645_s18 + $0x80] sm:$0xff]  ;;  %334 = vst [vmem:[%s1650_s19 + $0x30] sm:$0xff] %v333_v6  ;;  %336 = vst [vmem:[%s1650_s19 + $0x38] sm:$0xff] %v335_v7  ;;  %v339_v9 = vld [vmem:[%s1645_s18 + $0x88] sm:$0xff] }
  0x1a   : > { %338 = vst [vmem:[%s1650_s19 + $0x40] sm:$0xff] %v337_v8  ;;  %v341_v10 = vld [vmem:[%s1645_s18 + $0xa0] sm:$0xff]  ;;  %v343_v11 = vld [vmem:[%s1645_s18 + $0xa8] sm:$0xff]  ;;  %340 = vst [vmem:[%s1650_s19 + $0x48] sm:$0xff] %v339_v9 }
  0x1b   : > { %342 = vst [vmem:[%s1650_s19 + $0x50] sm:$0xff] %v341_v10  ;;  %344 = vst [vmem:[%s1650_s19 + $0x58] sm:$0xff] %v343_v11  ;;  %v345_v12 = vld [vmem:[%s1645_s18 + $0xc0] sm:$0xff]  ;;  %v347_v13 = vld [vmem:[%s1645_s18 + $0xc8] sm:$0xff] }
  0x1c   : > { %v349_v14 = vld [vmem:[%s1645_s18 + $0xe0] sm:$0xff]  ;;  %346 = vst [vmem:[%s1650_s19 + $0x60] sm:$0xff] %v345_v12  ;;  %348 = vst [vmem:[%s1650_s19 + $0x68] sm:$0xff] %v347_v13  ;;  %v351_v15 = vld [vmem:[%s1645_s18 + $0xe8] sm:$0xff] }
  0x1d   : > { %350 = vst [vmem:[%s1650_s19 + $0x70] sm:$0xff] %v349_v14  ;;  %v353_v16 = vld [vmem:[%s1645_s18 + $0x100] sm:$0xff]  ;;  %v355_v17 = vld [vmem:[%s1645_s18 + $0x108] sm:$0xff]  ;;  %352 = vst [vmem:[%s1650_s19 + $0x78] sm:$0xff] %v351_v15 }
  0x1e   : > { %354 = vst [vmem:[%s1650_s19 + $0x80] sm:$0xff] %v353_v16  ;;  %356 = vst [vmem:[%s1650_s19 + $0x88] sm:$0xff] %v355_v17  ;;  %v357_v18 = vld [vmem:[%s1645_s18 + $0x120] sm:$0xff]  ;;  %v359_v19 = vld [vmem:[%s1645_s18 + $0x128] sm:$0xff] }
  0x1f   : > { %v361_v20 = vld [vmem:[%s1645_s18 + $0x140] sm:$0xff]  ;;  %358 = vst [vmem:[%s1650_s19 + $0x90] sm:$0xff] %v357_v18  ;;  %360 = vst [vmem:[%s1650_s19 + $0x98] sm:$0xff] %v359_v19  ;;  %v363_v21 = vld [vmem:[%s1645_s18 + $0x148] sm:$0xff] }
  0x20   : > { %362 = vst [vmem:[%s1650_s19 + $0xa0] sm:$0xff] %v361_v20  ;;  %v365_v22 = vld [vmem:[%s1645_s18 + $0x160] sm:$0xff]  ;;  %v367_v23 = vld [vmem:[%s1645_s18 + $0x168] sm:$0xff]  ;;  %364 = vst [vmem:[%s1650_s19 + $0xa8] sm:$0xff] %v363_v21 }
  0x21   : > { %366 = vst [vmem:[%s1650_s19 + $0xb0] sm:$0xff] %v365_v22  ;;  %368 = vst [vmem:[%s1650_s19 + $0xb8] sm:$0xff] %v367_v23  ;;  %v369_v24 = vld [vmem:[%s1645_s18 + $0x180] sm:$0xff]  ;;  %v371_v25 = vld [vmem:[%s1645_s18 + $0x188] sm:$0xff] }
  0x22   : > { %v373_v26 = vld [vmem:[%s1645_s18 + $0x1a0] sm:$0xff]  ;;  %370 = vst [vmem:[%s1650_s19 + $0xc0] sm:$0xff] %v369_v24  ;;  %372 = vst [vmem:[%s1650_s19 + $0xc8] sm:$0xff] %v371_v25  ;;  %v375_v27 = vld [vmem:[%s1645_s18 + $0x1a8] sm:$0xff] }
  0x23   : > { %374 = vst [vmem:[%s1650_s19 + $0xd0] sm:$0xff] %v373_v26  ;;  %v377_v28 = vld [vmem:[%s1645_s18 + $0x1c0] sm:$0xff]  ;;  %v379_v29 = vld [vmem:[%s1645_s18 + $0x1c8] sm:$0xff]  ;;  %376 = vst [vmem:[%s1650_s19 + $0xd8] sm:$0xff] %v375_v27 }
  0x24   : > { %378 = vst [vmem:[%s1650_s19 + $0xe0] sm:$0xff] %v377_v28  ;;  %380 = vst [vmem:[%s1650_s19 + $0xe8] sm:$0xff] %v379_v29  ;;  %v381_v30 = vld [vmem:[%s1645_s18 + $0x1e0] sm:$0xff]  ;;  %v383_v31 = vld [vmem:[%s1645_s18 + $0x1e8] sm:$0xff] }
  0x25   : > { %382 = vst [vmem:[%s1650_s19 + $0xf0] sm:$0xff] %v381_v30  ;;  %384 = vst [vmem:[%s1650_s19 + $0xf8] sm:$0xff] %v383_v31 }
  0x26 PF: > { %398 = sbr.rel (!%p1623_p3) target bundleno = 50 (0x32), region = 59  ;;  %s400_s20 = sand.u32 (%p1623_p3), 1, %s1536_s25  }
  0x27   : > { %s1399_s21 = sshll.u32 (%p1623_p3), %s1544_s27, 3  ;;  %s1366_s22 = sshll.u32 (%p1623_p3), %s400_s20, 7 }
  0x28   : > { %s1720_s9 = scalar_lea.vmem (%p1623_p3), %s1877_s5, %s1399_s21  ;;  %s402_s8 = scalar_lea.vmem (%p1623_p3), [#allocation4], %s1366_s22 }
  0x29   : > { %v463_v32 = vld [vmem:[%s1720_s9] sm:$0xff] (%p1623_p3)  ;;  %v465_v33 = vld [vmem:[%s1720_s9 + $0x10] sm:$0xff] (%p1623_p3) }
  0x2a   : > { %v467_v34 = vld [vmem:[%s1720_s9 + $0x20] sm:$0xff] (%p1623_p3)  ;;  %464 = vst [vmem:[%s402_s8] sm:$0xff] (%p1623_p3), %v463_v32  ;;  %466 = vst [vmem:[%s402_s8 + $0x8] sm:$0xff] (%p1623_p3), %v465_v33  ;;  %v469_v35 = vld [vmem:[%s1720_s9 + $0x30] sm:$0xff] (%p1623_p3) }
  0x2b   : > { %468 = vst [vmem:[%s402_s8 + $0x10] sm:$0xff] (%p1623_p3), %v467_v34  ;;  %v471_v36 = vld [vmem:[%s1720_s9 + $0x40] sm:$0xff] (%p1623_p3)  ;;  %v473_v37 = vld [vmem:[%s1720_s9 + $0x50] sm:$0xff] (%p1623_p3)  ;;  %470 = vst [vmem:[%s402_s8 + $0x18] sm:$0xff] (%p1623_p3), %v469_v35 }
  0x2c   : > { %472 = vst [vmem:[%s402_s8 + $0x20] sm:$0xff] (%p1623_p3), %v471_v36  ;;  %474 = vst [vmem:[%s402_s8 + $0x28] sm:$0xff] (%p1623_p3), %v473_v37  ;;  %v475_v38 = vld [vmem:[%s1720_s9 + $0x60] sm:$0xff] (%p1623_p3)  ;;  %v477_v39 = vld [vmem:[%s1720_s9 + $0x70] sm:$0xff] (%p1623_p3) }
  0x2d   : > { %v479_v40 = vld [vmem:[%s1720_s9 + $0x80] sm:$0xff]  ;;  %476 = vst [vmem:[%s402_s8 + $0x30] sm:$0xff] %v475_v38  ;;  %478 = vst [vmem:[%s402_s8 + $0x38] sm:$0xff] %v477_v39  ;;  %v481_v41 = vld [vmem:[%s1720_s9 + $0x90] sm:$0xff] }
  0x2e   : > { %480 = vst [vmem:[%s402_s8 + $0x40] sm:$0xff] %v479_v40  ;;  %v483_v42 = vld [vmem:[%s1720_s9 + $0xa0] sm:$0xff]  ;;  %v485_v43 = vld [vmem:[%s1720_s9 + $0xb0] sm:$0xff]  ;;  %482 = vst [vmem:[%s402_s8 + $0x48] sm:$0xff] %v481_v41 }
  0x2f   : > { %484 = vst [vmem:[%s402_s8 + $0x50] sm:$0xff] %v483_v42  ;;  %486 = vst [vmem:[%s402_s8 + $0x58] sm:$0xff] %v485_v43  ;;  %v487_v44 = vld [vmem:[%s1720_s9 + $0xc0] sm:$0xff]  ;;  %v489_v45 = vld [vmem:[%s1720_s9 + $0xd0] sm:$0xff] }
  0x30   : > { %v491_v46 = vld [vmem:[%s1720_s9 + $0xe0] sm:$0xff]  ;;  %488 = vst [vmem:[%s402_s8 + $0x60] sm:$0xff] %v487_v44  ;;  %490 = vst [vmem:[%s402_s8 + $0x68] sm:$0xff] %v489_v45  ;;  %v493_v47 = vld [vmem:[%s1720_s9 + $0xf0] sm:$0xff] }
  0x31   : > { %492 = vst [vmem:[%s402_s8 + $0x70] sm:$0xff] %v491_v46  ;;  %494 = vst [vmem:[%s402_s8 + $0x78] sm:$0xff] %v493_v47 }
  0x32 PF: > { %p1369_p8 = scmp.ge.s32.totalorder %s1548_s28, 1  ;;  %p507_p9 = scmp.lt.s32.totalorder %s1548_s28, 3 }
  0x34   : > { %p508_p10 = pnand %p1369_p8, %p507_p9 }
  0x35   : > { %s1741_s10 = sand.u32 (!%p508_p10), 1, %s1532_s24   ;;  %v1746_v48 = vld [vmem:[%s1872_s0 + $0x8] sm:$0xff] (!%p508_p10)  ;;  %v1751_v49 = vld [vmem:[%s1872_s0 + $0x18] sm:$0xff] (!%p508_p10)  ;;  %v1550_v52 = vmov (!%p508_p10), 0   ;;  %v898_v31 = vld [vmem:[%s1874_s2] sm:$0xff] (!%p508_p10) }
  0x36   : > { %511 = sbr.rel (%p508_p10) target bundleno = 384 (0x180), region = 101  ;;  %s1370_s17 = sshll.u32 (!%p508_p10), %s1741_s10, 8  ;;  %v677_v50 = vunpack.c.l.s8.bf16 (!%p508_p10), %v1746_v48  ;;  %v679_v51 = vunpack.c.l.s8.bf16 (!%p508_p10), %v1751_v49  ;;  %1482 = vset.pattern.permute.xlu0 (!%p508_p10), %v1550_v52  ;;  %1483 = vset.pattern.permute.xlu1 (!%p508_p10), %v1550_v52  ;;  %v900_v32 = vld [vmem:[%s1874_s2 + $0x10] sm:$0xff] (!%p508_p10)  ;;  %v899_v35 = vld [vmem:[%s1874_s2 + $0x8] sm:$0xff] (!%p508_p10)  ;;  %v901_v36 = vld [vmem:[%s1874_s2 + $0x18] sm:$0xff] (!%p508_p10) }
  0x37   : > { %s1758_s24 = scalar_lea.vmem (!%p508_p10), [#allocation3], %s1370_s17  ;;  %s1371_s18 = sshll.u32 (!%p508_p10), %s1741_s10, 7  ;;  %905 = vperm.xlu0 (!%p508_p10), %1482, %v898_v31   ;;  %915 = vperm.xlu1 (!%p508_p10), %1483, %v900_v32  }
  0x38   : > { %v645_v53 = vld [vmem:[%s1758_s24 + $0x8] sm:$0xff] (!%p508_p10)  ;;  %v644_v55 = vld [vmem:[%s1758_s24] sm:$0xff] (!%p508_p10)  ;;  %781 = vmatprep.mubr.bf16.mxu1 (!%p508_p10), %v677_v50  ;;  %834 = vmatprep.mubr.bf16.mxu0 (!%p508_p10), %v679_v51  ;;  %v647_v63 = vld [vmem:[%s1758_s24 + $0x18] sm:$0xff] (!%p508_p10)  ;;  %s1771_s19 = scalar_lea.vmem (!%p508_p10), [#allocation4], %s1371_s18  ;;  %s1372_s14 = sshll.u32 (!%p508_p10), %s1741_s10, 6 }
  0x39   : > { %v661_v54 = vld [vmem:[%s1758_s24 + $0x88] sm:$0xff] (!%p508_p10)  ;;  %v685_v56 = vunpack.c.l.s8.bf16 (!%p508_p10), %v645_v53  ;;  %v687_v57 = vunpack.c.h.s8.bf16 (!%p508_p10), %v645_v53  ;;  %v660_v60 = vld [vmem:[%s1758_s24 + $0x80] sm:$0xff] (!%p508_p10)  ;;  %v684_v61 = vunpack.c.l.s8.bf16 (!%p508_p10), %v644_v55  ;;  %v663_v0 = vld [vmem:[%s1758_s24 + $0x98] sm:$0xff] (!%p508_p10)  ;;  %v686_v1 = vunpack.c.h.s8.bf16 (!%p508_p10), %v644_v55  ;;  %s581_s10 = scalar_lea.vmem (!%p508_p10), [#allocation5], %s1372_s14 }
  0x3a   : > { %v717_v58 = vunpack.c.l.s8.bf16 (!%p508_p10), %v661_v54  ;;  %v719_v59 = vunpack.c.h.s8.bf16 (!%p508_p10), %v661_v54  ;;  %v716_v62 = vunpack.c.l.s8.bf16 (!%p508_p10), %v660_v60  ;;  %v718_v2 = vunpack.c.h.s8.bf16 (!%p508_p10), %v660_v60  ;;  %v646_v5 = vld [vmem:[%s1758_s24 + $0x10] sm:$0xff] (!%p508_p10)  ;;  %v649_v11 = vld [vmem:[%s1758_s24 + $0x28] sm:$0xff] (!%p508_p10)  ;;  %v648_v15 = vld [vmem:[%s1758_s24 + $0x20] sm:$0xff] (!%p508_p10) }
  0x3b   : > { %749 = vmatprep.subr.bf16.mxu1 (!%p508_p10), %v685_v56  ;;  %v689_v3 = vunpack.c.l.s8.bf16 (!%p508_p10), %v647_v63  ;;  %v721_v4 = vunpack.c.l.s8.bf16 (!%p508_p10), %v663_v0  ;;  %v662_v6 = vld [vmem:[%s1758_s24 + $0x90] sm:$0xff] (!%p508_p10)  ;;  %v688_v7 = vunpack.c.l.s8.bf16 (!%p508_p10), %v646_v5  ;;  %v691_v9 = vunpack.c.h.s8.bf16 (!%p508_p10), %v647_v63  ;;  %v665_v12 = vld [vmem:[%s1758_s24 + $0xa8] sm:$0xff] (!%p508_p10)  ;;  %v664_v18 = vld [vmem:[%s1758_s24 + $0xa0] sm:$0xff] (!%p508_p10)  ;;  %910 = vperm.xlu0 (!%p508_p10), %1482, %v899_v35  }
  0x3c   : > { %802 = vmatprep.subr.bf16.mxu0 (!%p508_p10), %v717_v58  ;;  %750 = vmatpush1.bf16.msra.mxu1 (!%p508_p10), %v684_v61  ;;  %v720_v8 = vunpack.c.l.s8.bf16 (!%p508_p10), %v662_v6  ;;  %v723_v10 = vunpack.c.h.s8.bf16 (!%p508_p10), %v663_v0  ;;  %v690_v13 = vunpack.c.h.s8.bf16 (!%p508_p10), %v646_v5  ;;  %v722_v14 = vunpack.c.h.s8.bf16 (!%p508_p10), %v662_v6  ;;  %v651_v23 = vld [vmem:[%s1758_s24 + $0x38] sm:$0xff] (!%p508_p10)  ;;  %v650_v29 = vld [vmem:[%s1758_s24 + $0x30] sm:$0xff] (!%p508_p10)  ;;  %v653_v39 = vld [vmem:[%s1758_s24 + $0x48] sm:$0xff] (!%p508_p10) }
  0x3d   : > { %803 = vmatpush1.bf16.msra.mxu0 %v716_v62  ;;  %751 = vmatprep.subr.bf16.mxu1 %v687_v57  ;;  %v693_v16 = vunpack.c.l.s8.bf16 %v649_v11  ;;  %v725_v17 = vunpack.c.l.s8.bf16 %v665_v12  ;;  %v692_v19 = vunpack.c.l.s8.bf16 %v648_v15  ;;  %v724_v20 = vunpack.c.l.s8.bf16 %v664_v18  ;;  %v667_v24 = vld [vmem:[%s1758_s24 + $0xb8] sm:$0xff]  ;;  %v666_v30 = vld [vmem:[%s1758_s24 + $0xb0] sm:$0xff]  ;;  %v669_v40 = vld [vmem:[%s1758_s24 + $0xc8] sm:$0xff]  ;;  %s1400_s15 = sshll.u32 (%p1630_p6), %s1540_s26, 4 }
  0x3e   : > { %804 = vmatprep.subr.bf16.mxu0 %v719_v59  ;;  %v695_v21 = vunpack.c.h.s8.bf16 %v649_v11  ;;  %v727_v22 = vunpack.c.h.s8.bf16 %v665_v12  ;;  %v694_v25 = vunpack.c.h.s8.bf16 %v648_v15  ;;  %v726_v26 = vunpack.c.h.s8.bf16 %v664_v18  ;;  %920 = vperm.xlu1 %1483, %v901_v36   ;;  %v652_v45 = vld [vmem:[%s1758_s24 + $0x40] sm:$0xff]  ;;  %v655_v54 = vld [vmem:[%s1758_s24 + $0x58] sm:$0xff]  ;;  %v654_v60 = vld [vmem:[%s1758_s24 + $0x50] sm:$0xff] }
  0x3f   : > { %v697_v27 = vunpack.c.l.s8.bf16 %v651_v23  ;;  %v729_v28 = vunpack.c.l.s8.bf16 %v667_v24  ;;  %v696_v33 = vunpack.c.l.s8.bf16 %v650_v29  ;;  %v728_v34 = vunpack.c.l.s8.bf16 %v666_v30  ;;  %v668_v46 = vld [vmem:[%s1758_s24 + $0xc0] sm:$0xff]  ;;  %v671_v55 = vld [vmem:[%s1758_s24 + $0xd8] sm:$0xff]  ;;  %v670_v61 = vld [vmem:[%s1758_s24 + $0xd0] sm:$0xff] }
  0x40   : > { %752 = vmatpush1.bf16.msra.mxu1 %v686_v1  ;;  %v699_v37 = vunpack.c.h.s8.bf16 %v651_v23  ;;  %v731_v38 = vunpack.c.h.s8.bf16 %v667_v24  ;;  %v698_v41 = vunpack.c.h.s8.bf16 %v650_v29  ;;  %v730_v42 = vunpack.c.h.s8.bf16 %v666_v30  ;;  %v675_v15 = vld [vmem:[%s1758_s24 + $0xf8] sm:$0xff]  ;;  %v642_v29 = vld [vmem:[%s1872_s0 + $0x10] sm:$0xff]  ;;  %v1486_v30 = vld [vmem:[%s1771_s19 + $0x4] ss:$8 sps:$4 sm:$0xff]  }
  0x41   : > { %805 = vmatpush1.bf16.msra.mxu0 %v718_v2  ;;  %753 = vmatprep.subr.bf16.mxu1 %v689_v3  ;;  %v701_v43 = vunpack.c.l.s8.bf16 %v653_v39  ;;  %v733_v44 = vunpack.c.l.s8.bf16 %v669_v40  ;;  %v700_v47 = vunpack.c.l.s8.bf16 %v652_v45  ;;  %v732_v50 = vunpack.c.l.s8.bf16 %v668_v46  ;;  %v657_v2 = vld [vmem:[%s1758_s24 + $0x68] sm:$0xff] }
  0x42   : > { %806 = vmatprep.subr.bf16.mxu0 %v721_v4  ;;  %v703_v51 = vunpack.c.h.s8.bf16 %v653_v39  ;;  %v735_v53 = vunpack.c.h.s8.bf16 %v669_v40  ;;  %v702_v56 = vunpack.c.h.s8.bf16 %v652_v45  ;;  %v734_v57 = vunpack.c.h.s8.bf16 %v668_v46  ;;  %v673_v3 = vld [vmem:[%s1758_s24 + $0xe8] sm:$0xff]  ;;  %v1499_v45 = vld [vmem:[%s1771_s19 + $0x50] ss:$8 sps:$4 sm:$0xff]  }
  0x43   : > { %v705_v58 = vunpack.c.l.s8.bf16 %v655_v54  ;;  %v737_v59 = vunpack.c.l.s8.bf16 %v671_v55  ;;  %v704_v62 = vunpack.c.l.s8.bf16 %v654_v60  ;;  %v736_v63 = vunpack.c.l.s8.bf16 %v670_v61  ;;  %v1504_v46 = vld [vmem:[%s1771_s19 + $0x64] ss:$8 sps:$4 sm:$0xff]  }
  0x44   : > { %754 = vmatpush1.bf16.msra.mxu1 %v688_v7  ;;  %v707_v0 = vunpack.c.h.s8.bf16 %v655_v54  ;;  %v739_v1 = vunpack.c.h.s8.bf16 %v671_v55  ;;  %v706_v4 = vunpack.c.h.s8.bf16 %v654_v60  ;;  %v738_v5 = vunpack.c.h.s8.bf16 %v670_v61 }
  0x45   : > { %807 = vmatpush1.bf16.msra.mxu0 %v720_v8  ;;  %755 = vmatprep.subr.bf16.mxu1 %v691_v9  ;;  %v709_v6 = vunpack.c.l.s8.bf16 %v657_v2  ;;  %v741_v7 = vunpack.c.l.s8.bf16 %v673_v3  ;;  %v656_v8 = vld [vmem:[%s1758_s24 + $0x60] sm:$0xff]  ;;  %v711_v12 = vunpack.c.h.s8.bf16 %v657_v2  ;;  %v678_v32 = vunpack.c.l.s8.bf16 %v642_v29 }
  0x46   : > { %808 = vmatprep.subr.bf16.mxu0 %v723_v10  ;;  %v672_v9 = vld [vmem:[%s1758_s24 + $0xe0] sm:$0xff]  ;;  %v708_v10 = vunpack.c.l.s8.bf16 %v656_v8  ;;  %v681_v35 = vunpack.c.h.s8.bf16 %v1746_v48  ;;  %v683_v36 = vunpack.c.h.s8.bf16 %v1751_v49  ;;  %v682_v40 = vunpack.c.h.s8.bf16 %v642_v29  ;;  %v1495_v49 = vld [vmem:[%s1771_s19 + $0x34] ss:$8 sps:$4 sm:$0xff]  }
  0x47   : > { %v740_v11 = vunpack.c.l.s8.bf16 %v672_v9  ;;  %v1490_v48 = vld [vmem:[%s1771_s19 + $0x20] ss:$8 sps:$4 sm:$0xff]  }
  0x48   : > { %756 = vmatpush1.bf16.msra.mxu1 %v690_v13  ;;  %v743_v13 = vunpack.c.h.s8.bf16 %v673_v3 }
  0x49   : > { %809 = vmatpush1.bf16.msra.mxu0 %v722_v14  ;;  %757 = vmatprep.subr.bf16.mxu1 %v693_v16  ;;  %v659_v14 = vld [vmem:[%s1758_s24 + $0x78] sm:$0xff]  ;;  %v710_v16 = vunpack.c.h.s8.bf16 %v656_v8 }
  0x4a   : > { %810 = vmatprep.subr.bf16.mxu0 %v725_v17  ;;  %v742_v17 = vunpack.c.h.s8.bf16 %v672_v9  ;;  %v713_v18 = vunpack.c.l.s8.bf16 %v659_v14  ;;  %v715_v24 = vunpack.c.h.s8.bf16 %v659_v14 }
  0x4c   : > { %758 = vmatpush1.bf16.msra.mxu1 %v692_v19  ;;  %v745_v19 = vunpack.c.l.s8.bf16 %v675_v15 }
  0x4d   : > { %811 = vmatpush1.bf16.msra.mxu0 %v724_v20  ;;  %759 = vmatprep.subr.bf16.mxu1 %v695_v21  ;;  %v658_v20 = vld [vmem:[%s1758_s24 + $0x70] sm:$0xff] }
  0x4e   : > { %812 = vmatprep.subr.bf16.mxu0 %v727_v22  ;;  %v674_v21 = vld [vmem:[%s1758_s24 + $0xf0] sm:$0xff]  ;;  %v712_v22 = vunpack.c.l.s8.bf16 %v658_v20  ;;  %s1163_s24 = scalar_lea.vmem (%p1630_p6), %s1879_s7, %s1400_s15 }
  0x4f   : > { %v744_v23 = vunpack.c.l.s8.bf16 %v674_v21 }
  0x50   : > { %760 = vmatpush1.bf16.msra.mxu1 %v694_v25  ;;  %v747_v25 = vunpack.c.h.s8.bf16 %v675_v15 }
  0x51   : > { %813 = vmatpush1.bf16.msra.mxu0 %v726_v26  ;;  %761 = vmatprep.subr.bf16.mxu1 %v697_v27  ;;  %v714_v26 = vunpack.c.h.s8.bf16 %v658_v20  ;;  %v746_v27 = vunpack.c.h.s8.bf16 %v674_v21 }
  0x52   : > { %814 = vmatprep.subr.bf16.mxu0 %v729_v28  ;;  %v640_v28 = vld [vmem:[%s1872_s0] sm:$0xff] }
  0x53   : > { %v676_v31 = vunpack.c.l.s8.bf16 %v640_v28  ;;  %v680_v39 = vunpack.c.h.s8.bf16 %v640_v28 }
  0x54   : > { %762 = vmatpush1.bf16.msra.mxu1 %v696_v33  ;;  %v1484_v33 = vld [vmem:[%s1771_s19] ss:$8 sps:$4 sm:$0xff]  }
  0x55   : > { %815 = vmatpush1.bf16.msra.mxu0 %v728_v34  ;;  %763 = vmatprep.subr.bf16.mxu1 %v699_v37  ;;  %v1489_v34 = vld [vmem:[%s1771_s19 + $0x14] ss:$8 sps:$4 sm:$0xff]   ;;  %v1487_v37 = vld [vmem:[%s1771_s19 + $0x10] ss:$8 sps:$4 sm:$0xff]  }
  0x56   : > { %816 = vmatprep.subr.bf16.mxu0 %v731_v38  ;;  %v1492_v38 = vld [vmem:[%s1771_s19 + $0x24] ss:$8 sps:$4 sm:$0xff]  }
  0x58   : > { %764 = vmatpush1.bf16.msra.mxu1 %v698_v41  ;;  %v1493_v41 = vld [vmem:[%s1771_s19 + $0x30] ss:$8 sps:$4 sm:$0xff]  }
  0x59   : > { %817 = vmatpush1.bf16.msra.mxu0 %v730_v42  ;;  %765 = vmatprep.subr.bf16.mxu1 %v701_v43  ;;  %v1498_v42 = vld [vmem:[%s1771_s19 + $0x44] ss:$8 sps:$4 sm:$0xff]   ;;  %v1496_v43 = vld [vmem:[%s1771_s19 + $0x40] ss:$8 sps:$4 sm:$0xff]  }
  0x5a   : > { %818 = vmatprep.subr.bf16.mxu0 %v733_v44  ;;  %v1501_v44 = vld [vmem:[%s1771_s19 + $0x54] ss:$8 sps:$4 sm:$0xff]  }
  0x5c   : > { %766 = vmatpush1.bf16.msra.mxu1 %v700_v47  ;;  %v1502_v47 = vld [vmem:[%s1771_s19 + $0x60] ss:$8 sps:$4 sm:$0xff]  }
  0x5d   : > { %819 = vmatpush1.bf16.msra.mxu0 %v732_v50  ;;  %767 = vmatprep.subr.bf16.mxu1 %v703_v51  ;;  %v1505_v50 = vld [vmem:[%s1771_s19 + $0x70] ss:$8 sps:$4 sm:$0xff]   ;;  %v1508_v51 = vld [vmem:[%s1876_s4] sm:$0xff]  }
  0x5e   : > { %820 = vmatprep.subr.bf16.mxu0 %v735_v53  ;;  %v1509_v53 = vld [vmem:[%s1876_s4 + $0x8] sm:$0xff]  }
  0x60   : > { %768 = vmatpush1.bf16.msra.mxu1 %v702_v56 }
  0x61   : > { %821 = vmatpush1.bf16.msra.mxu0 %v734_v57  ;;  %769 = vmatprep.subr.bf16.mxu1 %v705_v58 }
  0x62   : > { %822 = vmatprep.subr.bf16.mxu0 %v737_v59 }
  0x64   : > { %770 = vmatpush1.bf16.msra.mxu1 %v704_v62 }
  0x65   : > { %823 = vmatpush1.bf16.msra.mxu0 %v736_v63  ;;  %771 = vmatprep.subr.bf16.mxu1 %v707_v0 }
  0x66   : > { %824 = vmatprep.subr.bf16.mxu0 %v739_v1 }
  0x68   : > { %772 = vmatpush1.bf16.msra.mxu1 %v706_v4 }
  0x69   : > { %825 = vmatpush1.bf16.msra.mxu0 %v738_v5  ;;  %773 = vmatprep.subr.bf16.mxu1 %v709_v6 }
  0x6a   : > { %826 = vmatprep.subr.bf16.mxu0 %v741_v7 }
  0x6c   : > { %774 = vmatpush1.bf16.msra.mxu1 %v708_v10  ;;  %v924_v10 = vlaneseq }
  0x6d   : > { %827 = vmatpush1.bf16.msra.mxu0 %v740_v11  ;;  %775 = vmatprep.subr.bf16.mxu1 %v711_v12 }
  0x6e   : > { %828 = vmatprep.subr.bf16.mxu0 %v743_v13  ;;  %v925_v15 = vshrl.u32 %v924_v10, 7 }
  0x70   : > { %776 = vmatpush1.bf16.msra.mxu1 %v710_v16 }
  0x71   : > { %829 = vmatpush1.bf16.msra.mxu0 %v742_v17  ;;  %777 = vmatprep.subr.bf16.mxu1 %v713_v18  ;;  %v926_v18 = vsub.s32 0, %v925_v15 }
  0x72   : > { %830 = vmatprep.subr.bf16.mxu0 %v745_v19  ;;  %v930_v19 = vsub.s32 1, %v925_v15 }
  0x74   : > { %778 = vmatpush1.bf16.msra.mxu1 %v712_v22 }
  0x75   : > { %831 = vmatpush1.bf16.msra.mxu0 %v744_v23  ;;  %779 = vmatprep.subr.bf16.mxu1 %v715_v24 }
  0x76   : > { %832 = vmatprep.subr.bf16.mxu0 %v747_v25 }
  0x78   : > { %780 = vmatpush1.bf16.msra.mxu1 %v714_v26 }
  0x79   : > { %833 = vmatpush1.bf16.msra.mxu0 %v746_v27  ;;  %1401 = vmatprep.subr.bf16.mxu1 %v1486_v30 }
  0x7a   : > { %1062 = vmatprep.subr.bf16.mxu0 %v1486_v30 }
  0x7b   : > { %782 = vmatmul.mubr.bf16.vlgmr.msra.gmra.mrb[0].mxu1 %v676_v31 }
  0x7c   : > { %835 = vmatmul.mubr.bf16.vlgmr.msra.gmra.mrb[0].mxu0 %v678_v32  ;;  %1409 = vmatpush1.bf16.msra.mxu1 %v1484_v33 }
  0x7d   : > { %1063 = vmatpush1.bf16.msra.mxu0 %v1484_v33  ;;  %1402 = vmatprep.subr.bf16.mxu1 %v1489_v34 }
  0x7e   : > { %1064 = vmatprep.subr.bf16.mxu0 %v1489_v34  ;;  %791 = vmatprep.mubr.bf16.mxu1 %v681_v35 }
  0x7f   : > { %844 = vmatprep.mubr.bf16.mxu0 %v683_v36 }
  0x80   : > { %1410 = vmatpush1.bf16.msra.mxu1 %v1487_v37 }
  0x81   : > { %1065 = vmatpush1.bf16.msra.mxu0 %v1487_v37  ;;  %1403 = vmatprep.subr.bf16.mxu1 %v1492_v38 }
  0x82   : > { %1066 = vmatprep.subr.bf16.mxu0 %v1492_v38 }
  0x83   : > { %792 = vmatmul.mubr.bf16.gmra.mrb[4].mxu1 %v680_v39 }
  0x84   : > { %845 = vmatmul.mubr.bf16.gmra.mrb[4].mxu0 %v682_v40  ;;  %1411 = vmatpush1.bf16.msra.mxu1 %v1490_v48 }
  0x85   : > { %1067 = vmatpush1.bf16.msra.mxu0 %v1490_v48  ;;  %1404 = vmatprep.subr.bf16.mxu1 %v1495_v49 }
  0x86   : > { %1068 = vmatprep.subr.bf16.mxu0 %v1495_v49  ;;  %1094 = vmatprep.mubr.bf16.mxu0 %v1550_v52 }
  0x87   : > { %1104 = vmatprep.mubr.bf16.mxu1 %v1550_v52  ;;  %v1507_v52 = vld [vmem:[%s1771_s19 + $0x74] ss:$8 sps:$4 sm:$0xff]   ;;  %s1373_s19 = sshll.u32 %s1540_s26, 1 }
  0x88   : > { %1412 = vmatpush1.bf16.msra.mxu1 %v1493_v41  ;;  %p601_p11 = scmp.lt.s32.totalorder %s1373_s19, 3 }
  0x89   : > { %1069 = vmatpush1.bf16.msra.mxu0 %v1493_v41  ;;  %1405 = vmatprep.subr.bf16.mxu1 %v1498_v42 }
  0x8a   : > { %1070 = vmatprep.subr.bf16.mxu0 %v1498_v42  ;;  %s1889_s19 = smov (!%p601_p11, %s1373_s19), 3 }
  0x8b   : > { %s603_s30 = scalar_lea.vmem %s1875_s3, %s1889_s19  ;;  %s615_s13 = scalar_lea.vmem %s1878_s6, %s1889_s19 }
  0x8c   : > { %1413 = vmatpush1.bf16.msra.mxu1 %v1496_v43  ;;  %v902_v22 = vld [vmem:[%s603_s30] sm:$0x3] }
  0x8d   : > { %1071 = vmatpush1.bf16.msra.mxu0 %v1496_v43  ;;  %1406 = vmatprep.subr.bf16.mxu1 %v1501_v44  ;;  %v927_v31 = vrot.slane %v902_v22, %v926_v18  ;;  %v931_v32 = vrot.slane %v902_v22, %v930_v19 }
  0x8e   : > { %1072 = vmatprep.subr.bf16.mxu0 %v1501_v44 }
  0x90   : > { %1414 = vmatpush1.bf16.msra.mxu1 %v1499_v45 }
  0x91   : > { %1073 = vmatpush1.bf16.msra.mxu0 %v1499_v45  ;;  %1407 = vmatprep.subr.bf16.mxu1 %v1504_v46 }
  0x92   : > { %1074 = vmatprep.subr.bf16.mxu0 %v1504_v46 }
  0x94   : > { %1415 = vmatpush1.bf16.msra.mxu1 %v1502_v47 }
  0x95   : > { %1075 = vmatpush1.bf16.msra.mxu0 %v1502_v47  ;;  %1408 = vmatprep.subr.bf16.mxu1 %v1507_v52 }
  0x96   : > { %1076 = vmatprep.subr.bf16.mxu0 %v1507_v52  ;;  %v1123_v52 = vld [vmem:[%s615_s13] sm:$0x3] }
  0x98   : > { %1416 = vmatpush1.bf16.msra.mxu1 %v1505_v50 }
  0x99   : > { %1077 = vmatpush1.bf16.msra.mxu0 %v1505_v50 }
  0x9b   : > { %1105 = vmatmul.mubr.bf16.vlgmr.msra.gmra.mrb[8].mxu1 %v1509_v53 }
  0x9c   : > { %1095 = vmatmul.mubr.bf16.vlgmr.msra.gmra.mrb[8].mxu0 %v1508_v51 }
  0xb6   : > { %v906_v20 = vpop.permute.xlu0 %905  ;;  %v916_v24 = vpop.permute.xlu1 %915 }
  0xb7   : > { %v938_v39 = vmul.f32 %v927_v31, %v916_v24  ;;  %v934_v42 = vmul.f32 %v927_v31, %v906_v20  ;;  %v935_v43 = vmul.f32 %v931_v32, %v906_v20  ;;  %v939_v47 = vmul.f32 %v931_v32, %v916_v24 }
  0xba   : > { %v911_v36 = vpop.permute.xlu0 %910 }
  0xbb   : > { %v936_v45 = vmul.f32 %v927_v31, %v911_v36 }
  0xbd   : > { %v921_v49 = vpop.permute.xlu1 %920 }
  0xbe   : > { %v940_v53 = vmul.f32 %v927_v31, %v921_v49 }
 0x14e   : > { %v783_v54 = vpop.f32.mrb[0].mxu1 }
 0x14f   : > { %v836_v55 = vpop.f32.mrb[0].mxu0  ;;  %v785_v57 = vpop.f32.mrb[1].mxu1 }
 0x150   : > { %v837_v56 = vadd.f32 %v836_v55, %v783_v54  ;;  %v838_v58 = vpop.f32.mrb[1].mxu0  ;;  %v787_v60 = vpop.f32.mrb[2].mxu1 }
 0x151   : > { %v839_v59 = vadd.f32 %v838_v58, %v785_v57  ;;  %v840_v61 = vpop.f32.mrb[2].mxu0  ;;  %v789_v63 = vpop.f32.mrb[3].mxu1  ;;  %v941_v58 = vmul.f32 %v931_v32, %v921_v49 }
 0x152   : > { %v841_v62 = vadd.f32 %v840_v61, %v787_v60  ;;  %v842_v0 = vpop.f32.mrb[3].mxu0  ;;  %v1425_v17 = vtrunc.f32 %v837_v56  ;;  %v937_v56 = vmul.f32 %v931_v32, %v911_v36  ;;  %v1128_v60 = vrot.slane %v1123_v52, %v926_v18 }
 0x153   : > { %v843_v1 = vadd.f32 %v842_v0, %v789_v63  ;;  %v1427_v21 = vtrunc.f32 %v839_v59  ;;  %v1132_v0 = vrot.slane %v1123_v52, %v930_v19 }
 0x154   : > { %v1429_v25 = vtrunc.f32 %v841_v62  ;;  %v1426_v30 = vcvt.f32.s32 %v1425_v17 }
 0x155   : > { %v1431_v28 = vtrunc.f32 %v843_v1  ;;  %v1428_v33 = vcvt.f32.s32 %v1427_v21 }
 0x156   : > { %v793_v2 = vpop.f32.mrb[4].mxu1  ;;  %v1430_v35 = vcvt.f32.s32 %v1429_v25  ;;  %v890_v41 = vcvt.s32.f32 %v1426_v30 }
 0x157   : > { %v846_v3 = vpop.f32.mrb[4].mxu0  ;;  %v795_v5 = vpop.f32.mrb[5].mxu1  ;;  %v1432_v40 = vcvt.f32.s32 %v1431_v28  ;;  %v891_v44 = vcvt.s32.f32 %v1428_v33 }
 0x158   : > { %v847_v4 = vadd.f32 %v846_v3, %v793_v2  ;;  %v848_v6 = vpop.f32.mrb[5].mxu0  ;;  %v797_v8 = vpop.f32.mrb[6].mxu1  ;;  %v892_v50 = vcvt.s32.f32 %v1430_v35  ;;  %v942_v59 = vmul.f32 %v934_v42, %v890_v41 }
 0x159   : > { %v849_v7 = vadd.f32 %v848_v6, %v795_v5  ;;  %v850_v9 = vpop.f32.mrb[6].mxu0  ;;  %v799_v12 = vpop.f32.mrb[7].mxu1  ;;  %v893_v55 = vcvt.s32.f32 %v1432_v40  ;;  %v943_v63 = vmul.f32 %v935_v43, %v891_v44 }
 0x15a   : > { %v851_v11 = vadd.f32 %v850_v9, %v797_v8  ;;  %v852_v13 = vpop.f32.mrb[7].mxu0  ;;  %v1433_v16 = vtrunc.f32 %v847_v4  ;;  %v944_v6 = vmul.f32 %v936_v45, %v892_v50 }
 0x15b   : > { %v853_v14 = vadd.f32 %v852_v13, %v799_v12  ;;  %v1435_v23 = vtrunc.f32 %v849_v7  ;;  %v945_v12 = vmul.f32 %v937_v56, %v893_v55 }
 0x15c   : > { %v1434_v26 = vcvt.f32.s32 %v1433_v16  ;;  %v1437_v27 = vtrunc.f32 %v851_v11 }
 0x15d   : > { %v1439_v29 = vtrunc.f32 %v853_v14  ;;  %v1436_v34 = vcvt.f32.s32 %v1435_v23 }
 0x15e   : > { %v894_v37 = vcvt.s32.f32 %v1434_v26  ;;  %v1438_v38 = vcvt.f32.s32 %v1437_v27 }
 0x15f   : > { %v1440_v48 = vcvt.f32.s32 %v1439_v29  ;;  %v895_v46 = vcvt.s32.f32 %v1436_v34 }
 0x160   : > { %v896_v51 = vcvt.s32.f32 %v1438_v38  ;;  %v946_v54 = vmul.f32 %v938_v39, %v894_v37 }
 0x161   : > { %v897_v57 = vcvt.s32.f32 %v1440_v48  ;;  %v947_v1 = vmul.f32 %v939_v47, %v895_v46 }
 0x162   : > { %v948_v7 = vmul.f32 %v940_v53, %v896_v51 }
 0x163   : > { %v949_v13 = vmul.f32 %v941_v58, %v897_v57 }
 0x16e   : > { %v1106_v62 = vpop.f32.mrb[8].mxu1 }
 0x16f   : > { %v1096_v61 = vpop.f32.mrb[8].mxu0  ;;  %v1119_v3 = vadd.f32 %v1106_v62, %v946_v54  ;;  %v1108_v5 = vpop.f32.mrb[9].mxu1 }
 0x170   : > { %v1115_v2 = vadd.f32 %v1096_v61, %v942_v59  ;;  %v1098_v4 = vpop.f32.mrb[9].mxu0  ;;  %v1120_v9 = vadd.f32 %v1108_v5, %v947_v1  ;;  %v1110_v11 = vpop.f32.mrb[10].mxu1 }
 0x171   : > { %v1116_v8 = vadd.f32 %v1098_v4, %v943_v63  ;;  %v1100_v10 = vpop.f32.mrb[10].mxu0  ;;  %v1139_v15 = vadd.f32 %v1128_v60, %v1119_v3  ;;  %v1121_v17 = vadd.f32 %v1110_v11, %v948_v7  ;;  %v1112_v20 = vpop.f32.mrb[11].mxu1  ;;  %1157 = sbr.rel (!%p1630_p6) target bundleno = 384 (0x180), region = 121 }
 0x172   : > { %v1135_v14 = vadd.f32 %v1128_v60, %v1115_v2  ;;  %v1117_v16 = vadd.f32 %v1100_v10, %v944_v6  ;;  %v1102_v18 = vpop.f32.mrb[11].mxu0  ;;  %v1140_v21 = vadd.f32 %v1132_v0, %v1120_v9  ;;  %v1122_v23 = vadd.f32 %v1112_v20, %v949_v13 }
 0x173   : > { %v1136_v19 = vadd.f32 %v1132_v0, %v1116_v8  ;;  %v1118_v22 = vadd.f32 %v1102_v18, %v945_v12  ;;  %1147 = vst [vmem:[%s581_s10 + $0x20] sm:$0xff] %v1139_v15  ;;  %v1141_v25 = vadd.f32 %v1128_v60, %v1121_v17 }
 0x174   : > { %1143 = vst [vmem:[%s581_s10] sm:$0xff] %v1135_v14  ;;  %v1137_v24 = vadd.f32 %v1128_v60, %v1117_v16  ;;  %1148 = vst [vmem:[%s581_s10 + $0x28] sm:$0xff] %v1140_v21  ;;  %v1142_v27 = vadd.f32 %v1132_v0, %v1122_v23 }
 0x175   : > { %1144 = vst [vmem:[%s581_s10 + $0x8] sm:$0xff] %v1136_v19  ;;  %v1138_v26 = vadd.f32 %v1132_v0, %v1118_v22  ;;  %1149 = vst [vmem:[%s581_s10 + $0x30] sm:$0xff] %v1141_v25 }
 0x176   : > { %1145 = vst [vmem:[%s581_s10 + $0x10] sm:$0xff] %v1137_v24  ;;  %1150 = vst [vmem:[%s581_s10 + $0x38] sm:$0xff] %v1142_v27 }
 0x177   : > { %1146 = vst [vmem:[%s581_s10 + $0x18] sm:$0xff] %v1138_v26 }
 0x17a   : > { %v1184_v32 = vld [vmem:[%s581_s10 + $0x20] sm:$0xff] }
 0x17b   : > { %v1176_v28 = vld [vmem:[%s581_s10] sm:$0xff]  ;;  %v1186_v33 = vld [vmem:[%s581_s10 + $0x28] sm:$0xff]  ;;  %1185 = vst [vmem:[%s1163_s24 + $0x40] sm:$0xff] %v1184_v32 }
 0x17c   : > { %v1178_v29 = vld [vmem:[%s581_s10 + $0x8] sm:$0xff]  ;;  %1177 = vst [vmem:[%s1163_s24] sm:$0xff] %v1176_v28  ;;  %1187 = vst [vmem:[%s1163_s24 + $0x48] sm:$0xff] %v1186_v33  ;;  %v1188_v34 = vld [vmem:[%s581_s10 + $0x30] sm:$0xff] }
 0x17d   : > { %v1180_v30 = vld [vmem:[%s581_s10 + $0x10] sm:$0xff]  ;;  %1179 = vst [vmem:[%s1163_s24 + $0x8] sm:$0xff] %v1178_v29  ;;  %v1190_v35 = vld [vmem:[%s581_s10 + $0x38] sm:$0xff]  ;;  %1189 = vst [vmem:[%s1163_s24 + $0x60] sm:$0xff] %v1188_v34 }
 0x17e   : > { %v1182_v31 = vld [vmem:[%s581_s10 + $0x18] sm:$0xff]  ;;  %1181 = vst [vmem:[%s1163_s24 + $0x20] sm:$0xff] %v1180_v30  ;;  %1191 = vst [vmem:[%s1163_s24 + $0x68] sm:$0xff] %v1190_v35 }
 0x17f   : > { %1183 = vst [vmem:[%s1163_s24 + $0x28] sm:$0xff] %v1182_v31 }
 0x180 PF: > { %s17_s28 = sadd.s32 1, %s1548_s28   ;;  %s1882_s24 = smov %s1536_s25 }
 0x181   : > { %p14_p12 = scmp.ge.s32.totalorder %s17_s28, 4   ;;  %s1883_s25 = smov %s1635_s12 }
 0x182   : > { %s1884_s26 = smov %s1544_s27  ;;  %s1885_s27 = smov %s1887_s29 }
 0x183   :  { %16 = sbr.rel (!%p14_p12) target bundleno = 3 (0x3), region = 198 }

</bundles_post_ra>
